<compile_context>
chip_gen: v6e
topology: v6e:2x2x1
jax: 0.10.0
libtpu: 0.0.40
codegen_flags: <defaults>
</compile_context>

<pallas_src>
import functools
import math

import jax
import jax.numpy as jnp
from jax import lax
from jax.experimental import pallas as pl
from jax.experimental.pallas import tpu as pltpu


_MASK_VALUE = -1e30  # large finite negative; avoids inf-inf -> NaN in online max


def _pick_tile(dim, target, align):
    """Largest tile <= target dividing `dim`, preferring `align` multiples.
    Returns the full dim when dim <= target (the "equal to array dim" escape
    of the (8,128) block-shape rule)."""
    if dim <= target:
        return dim
    t = (target // align) * align
    while t >= align:
        if dim % t == 0:
            return t
        t -= align
    t = min(target, dim)
    while t > 1:
        if dim % t == 0:
            return t
        t -= 1
    return 1


# ----------------------------------------------------------------------------
# Tiled matmul (used for the fused QKV projection and for o_proj)
# ----------------------------------------------------------------------------

def _matmul_kernel(x_ref, w_ref, o_ref, acc_ref):
    @pl.when(pl.program_id(2) == 0)
    def _init():
        acc_ref[...] = jnp.zeros_like(acc_ref)

    acc_ref[...] += jnp.dot(x_ref[...], w_ref[...],
                            preferred_element_type=jnp.float32)

    @pl.when(pl.program_id(2) == pl.num_programs(2) - 1)
    def _store():
        o_ref[...] = acc_ref[...].astype(o_ref.dtype)


def matmul(x, w, *, tm=256, tn=256, tk=512):
    """y = x @ w with an f32 VMEM accumulator; K (reduction) axis innermost."""
    M, K = x.shape
    K2, N = w.shape
    assert K == K2
    bm = _pick_tile(M, tm, 8)
    bn = _pick_tile(N, tn, 128)
    bk = _pick_tile(K, tk, 128)
    return pl.pallas_call(
        _matmul_kernel,
        out_shape=jax.ShapeDtypeStruct((M, N), x.dtype),
        grid=(M // bm, N // bn, K // bk),
        in_specs=[
            pl.BlockSpec((bm, bk), lambda i, j, k: (i, k)),
            pl.BlockSpec((bk, bn), lambda i, j, k: (k, j)),
        ],
        out_specs=pl.BlockSpec((bm, bn), lambda i, j, k: (i, j)),
        scratch_shapes=[pltpu.VMEM((bm, bn), jnp.float32)],
        compiler_params=pltpu.CompilerParams(
            dimension_semantics=("parallel", "parallel", "arbitrary")),
    )(x, w)


# ----------------------------------------------------------------------------
# RoPE (hoisted out of the attention kv loop; sign folded into the sin table)
# ----------------------------------------------------------------------------

def _rope_kernel(x_ref, cos_ref, sin_ref, o_ref, *, half, scale, use_roll):
    x = x_ref[...]
    if use_roll:
        # sign is folded into sin -> plain half rotation [x2, x1] on the XLU
        rot = pltpu.roll(x, shift=half, axis=-1)
    else:
        rot = jnp.concatenate([x[:, half:], x[:, :half]], axis=-1)
    out = x * cos_ref[...] + rot * sin_ref[...]
    if scale != 1.0:
        out = out * scale            # fold 1/sqrt(head_dim) into q here (free)
    o_ref[...] = out.astype(o_ref.dtype)


def rope_apply(x, cos, sin_signed, *, scale=1.0, block_rows=1024):
    """x: (B, G, R, D); cos / sin_signed: (R, D) sign-folded tables."""
    B, G, R, D = x.shape
    br = _pick_tile(R, block_rows, 8)
    cos = cos.astype(x.dtype)
    sin_signed = sin_signed.astype(x.dtype)
    kernel = functools.partial(_rope_kernel, half=D // 2, scale=scale,
                               use_roll=(D % 128 == 0))
    return pl.pallas_call(
        kernel,
        out_shape=jax.ShapeDtypeStruct(x.shape, x.dtype),
        grid=(B, G, R // br),
        in_specs=[
            pl.BlockSpec((None, None, br, D), lambda b, g, r: (b, g, r, 0)),
            pl.BlockSpec((br, D), lambda b, g, r: (r, 0)),
            pl.BlockSpec((br, D), lambda b, g, r: (r, 0)),
        ],
        out_specs=pl.BlockSpec((None, None, br, D), lambda b, g, r: (b, g, r, 0)),
        compiler_params=pltpu.CompilerParams(
            dimension_semantics=("parallel", "parallel", "parallel")),
    )(x, cos, sin_signed)


# ----------------------------------------------------------------------------
# Causal GQA flash attention (online softmax over kv blocks)
# ----------------------------------------------------------------------------

def _flash_gqa_kernel(q_ref, k_ref, v_ref, o_ref, m_ref, l_ref, acc_ref,
                      *, n_rep, tq, tk):
    qi = pl.program_id(2)
    kv = pl.program_id(3)

    @pl.when(kv == 0)
    def _init():
        m_ref[...] = jnp.full_like(m_ref, _MASK_VALUE)
        l_ref[...] = jnp.zeros_like(l_ref)
        acc_ref[...] = jnp.zeros_like(acc_ref)

    # Skip kv blocks that lie entirely above the causal diagonal.
    @pl.when(kv * tk <= qi * tq + (tq - 1))
    def _compute():
        q = q_ref[...]                       # (tq*n_rep, D), RoPE'd + pre-scaled
        k = k_ref[...]                       # (tk, D), shared by all n_rep heads
        v = v_ref[...]                       # (tk, D)
        s = lax.dot_general(q, k, (((1,), (1,)), ((), ())),
                            preferred_element_type=jnp.float32)  # (tq*n_rep, tk)

        row = lax.broadcasted_iota(jnp.int32, s.shape, 0)
        col = lax.broadcasted_iota(jnp.int32, s.shape, 1)
        q_pos = qi * tq + row // n_rep       # rows are ordered (seq, rep)
        k_pos = kv * tk + col
        s = jnp.where(k_pos <= q_pos, s, _MASK_VALUE)

        m_prev = m_ref[...]
        m_new = jnp.maximum(m_prev, jnp.max(s, axis=-1, keepdims=True))
        alpha = jnp.exp(m_prev - m_new)
        p = jnp.exp(s - m_new)
        l_ref[...] = alpha * l_ref[...] + jnp.sum(p, axis=-1, keepdims=True)
        acc_ref[...] = alpha * acc_ref[...] + jnp.dot(
            p.astype(v.dtype), v, preferred_element_type=jnp.float32)
        m_ref[...] = m_new

    @pl.when(kv == pl.num_programs(3) - 1)
    def _finalize():
        inv_l = pl.reciprocal(l_ref[...], approx=True)
        o_ref[...] = (acc_ref[...] * inv_l).astype(o_ref.dtype)


def flash_gqa_attention(q, k, v, *, n_rep, block_q=256, block_k=256):
    """q: (B, KVH, S*n_rep, D) rows ordered (seq, rep); k, v: (B, KVH, S, D)."""
    B, G, R, D = q.shape
    S = k.shape[2]
    assert R == S * n_rep
    tq = _pick_tile(S, block_q, 8)
    tk = _pick_tile(S, block_k, 8)
    rows = tq * n_rep
    kernel = functools.partial(_flash_gqa_kernel, n_rep=n_rep, tq=tq, tk=tk)
    return pl.pallas_call(
        kernel,
        out_shape=jax.ShapeDtypeStruct((B, G, R, D), q.dtype),
        grid=(B, G, S // tq, S // tk),
        in_specs=[
            pl.BlockSpec((None, None, rows, D), lambda b, g, i, j: (b, g, i, 0)),
            pl.BlockSpec((None, None, tk, D), lambda b, g, i, j: (b, g, j, 0)),
            pl.BlockSpec((None, None, tk, D), lambda b, g, i, j: (b, g, j, 0)),
        ],
        out_specs=pl.BlockSpec((None, None, rows, D),
                               lambda b, g, i, j: (b, g, i, 0)),
        scratch_shapes=[
            pltpu.VMEM((rows, 1), jnp.float32),   # running row max
            pltpu.VMEM((rows, 1), jnp.float32),   # running denominator
            pltpu.VMEM((rows, D), jnp.float32),   # f32 output accumulator
        ],
        compiler_params=pltpu.CompilerParams(
            dimension_semantics=("parallel", "parallel", "parallel", "arbitrary")),
    )(q, k, v)


# ----------------------------------------------------------------------------
# Module glue (plain JAX between the Pallas hot paths)
# ----------------------------------------------------------------------------

def rope_tables(head_dim, max_seq_len):
    inv_freq = 1.0 / (10000.0 ** (
        jnp.arange(0, head_dim, 2, dtype=jnp.float32) / head_dim))
    t = jnp.arange(max_seq_len, dtype=jnp.float32)[:, None]
    freqs = t * inv_freq[None, :]                         # (S, D/2)
    cos = jnp.cos(jnp.concatenate([freqs, freqs], axis=-1))
    sin_half = jnp.sin(freqs)
    # sign folded so rotate_half becomes an unsigned half rotation in-kernel
    sin_signed = jnp.concatenate([-sin_half, sin_half], axis=-1)
    return cos, sin_signed


def attention_forward(params, hidden_states, cfg, *,
                      attn_block_q=256, attn_block_k=256):
    B, S, Hd = hidden_states.shape
    nh = cfg["num_attention_heads"]
    nkvh = cfg["num_key_value_heads"]
    hd = cfg["head_dim"]
    n_rep = nh // nkvh
    Nq, Nk = nh * hd, nkvh * hd

    # fused QKV projection: x read from HBM once, one tiled matmul
    x2d = hidden_states.reshape(B * S, Hd)
    qkv = matmul(x2d, params["wqkv_t"])                   # (B*S, Nq + 2*Nk)
    q = qkv[:, :Nq]
    k = qkv[:, Nq:Nq + Nk]
    v = qkv[:, Nq + Nk:]

    # regroup to GQA layout: q rows ordered (seq, rep) inside each kv group
    qg = (q.reshape(B, S, nkvh, n_rep, hd)
            .transpose(0, 2, 1, 3, 4)
            .reshape(B, nkvh, S * n_rep, hd))
    kg = k.reshape(B, S, nkvh, hd).transpose(0, 2, 1, 3)
    vg = v.reshape(B, S, nkvh, hd).transpose(0, 2, 1, 3)

    # RoPE (hoisted out of the attention kv loop); 1/sqrt(d) folded into q
    cos = params["rope_cos"][:S]
    sin = params["rope_sin_signed"][:S]
    cos_q = jnp.repeat(cos, n_rep, axis=0)                # rows ordered (seq, rep)
    sin_q = jnp.repeat(sin, n_rep, axis=0)
    qg = rope_apply(qg, cos_q, sin_q, scale=1.0 / math.sqrt(hd))
    kg = rope_apply(kg, cos, sin, scale=1.0)

    # causal GQA flash attention
    og = flash_gqa_attention(qg, kg, vg, n_rep=n_rep,
                             block_q=attn_block_q, block_k=attn_block_k)

    # back to (B*S, nh*hd) and output projection
    o2d = (og.reshape(B, nkvh, S, n_rep, hd)
             .transpose(0, 2, 1, 3, 4)
             .reshape(B * S, nh * hd))
    out = matmul(o2d, params["wo_t"]).reshape(B, S, Hd)
    # residual_dropout / attention_dropout: identity (p = 0.0, eval mode)
    return out


# ----------------------------------------------------------------------------
# Pure-JAX reference (mirrors the PyTorch forward) for validation
# ----------------------------------------------------------------------------

def attention_reference(params, hidden_states, cfg):
    B, S, Hd = hidden_states.shape
    nh = cfg["num_attention_heads"]
    nkvh = cfg["num_key_value_heads"]
    hd = cfg["head_dim"]
    n_rep = nh // nkvh
    Nq, Nk = nh * hd, nkvh * hd
    w = params["wqkv_t"]

    q = (hidden_states @ w[:, :Nq]).reshape(B, S, nh, hd)
    k = (hidden_states @ w[:, Nq:Nq + Nk]).reshape(B, S, nkvh, hd)
    v = (hidden_states @ w[:, Nq + Nk:]).reshape(B, S, nkvh, hd)

    inv_freq = 1.0 / (10000.0 ** (jnp.arange(0, hd, 2, dtype=jnp.float32) / hd))
    t = jnp.arange(S, dtype=jnp.float32)[:, None]
    freqs = t * inv_freq[None, :]
    emb = jnp.concatenate([freqs, freqs], axis=-1)
    cos = jnp.cos(emb)[None, :, None, :]
    sin = jnp.sin(emb)[None, :, None, :]

    def rot_half(u):
        h = u.shape[-1] // 2
        return jnp.concatenate([-u[..., h:], u[..., :h]], axis=-1)

    q = q * cos + rot_half(q) * sin
    k = k * cos + rot_half(k) * sin
    k = jnp.repeat(k, n_rep, axis=2)
    v = jnp.repeat(v, n_rep, axis=2)

    q = q.transpose(0, 2, 1, 3)
    k = k.transpose(0, 2, 1, 3)
    v = v.transpose(0, 2, 1, 3)

    scores = jnp.einsum("bhqd,bhkd->bhqk", q, k) / math.sqrt(hd)
    mask = jnp.tril(jnp.ones((S, S), dtype=bool))
    scores = jnp.where(mask[None, None], scores, -jnp.inf)
    p = jax.nn.softmax(scores, axis=-1)
    out = jnp.einsum("bhqk,bhkd->bhqd", p, v)
    out = out.transpose(0, 2, 1, 3).reshape(B, S, nh * hd)
    return out @ params["wo_t"]


# ----------------------------------------------------------------------------
# Main
# ----------------------------------------------------------------------------

if __name__ == "__main__":
    cfg = dict(
        hidden_size=32,
        num_attention_heads=4,
        num_key_value_heads=2,
        head_dim=8,             # hidden_size // num_attention_heads
        dropout=0.0,
        attention_bias=False,   # nn.Linear bias disabled
        flash_attn=True,
        max_seq_len=32,
    )
    B, S = 2, 16
    Hd = cfg["hidden_size"]
    nh, nkvh, hd = (cfg["num_attention_heads"], cfg["num_key_value_heads"],
                    cfg["head_dim"])

    key = jax.random.PRNGKey(0)
    kx, k1, k2, k3, k4 = jax.random.split(key, 5)
    x = jax.random.normal(kx, (B, S, Hd), dtype=jnp.float32)

    wscale = 0.02
    wq_t = wscale * jax.random.normal(k1, (Hd, nh * hd), dtype=jnp.float32)
    wk_t = wscale * jax.random.normal(k2, (Hd, nkvh * hd), dtype=jnp.float32)
    wv_t = wscale * jax.random.normal(k3, (Hd, nkvh * hd), dtype=jnp.float32)
    wo_t = wscale * jax.random.normal(k4, (nh * hd, Hd), dtype=jnp.float32)
    cos_tab, sin_tab = rope_tables(hd, cfg["max_seq_len"])
    params = {
        "wqkv_t": jnp.concatenate([wq_t, wk_t, wv_t], axis=1),
        "wo_t": wo_t,
        "rope_cos": cos_tab,
        "rope_sin_signed": sin_tab,
    }

    # run 1: default (single-block) tiles; run 2: forced small tiles so the
    # multi-block flash loop (init / accumulate / causal skip / finalize) is
    # actually exercised on this small problem.
    out_default = jax.block_until_ready(attention_forward(params, x, cfg))
    out_tiled = jax.block_until_ready(
        attention_forward(params, x, cfg, attn_block_q=8, attn_block_k=8))

    ref = attention_reference(params, x, cfg)
    assert out_default.shape == (B, S, Hd)
    assert out_tiled.shape == (B, S, Hd)
    # 1e-3 tolerance: exact f32 matmuls/softmax; only the approximate EUP
    # reciprocal in the flash finalize differs from the exact reference.
    assert jnp.allclose(out_default, ref, atol=1e-3, rtol=1e-3), "default-tile mismatch"
    assert jnp.allclose(out_tiled, ref, atol=1e-3, rtol=1e-3), "tiled mismatch"
    assert jnp.allclose(out_default, out_tiled, atol=1e-3, rtol=1e-3), "tiling mismatch"

    print("KERNEL_OK")
</pallas_src>

<mosaic_0001>
module attributes {stable_mosaic.version = 11 : i64} {
  func.func @_matmul_kernel(%arg0: i32, %arg1: i32, %arg2: i32, %arg3: memref<32x32xf32, #tpu.memory_space<vmem>>, %arg4: memref<32x64xf32, #tpu.memory_space<vmem>>, %arg5: memref<32x64xf32, #tpu.memory_space<vmem>>, %arg6: memref<32x64xf32, #tpu.memory_space<vmem>>) attributes {dimension_semantics = [#tpu.dimension_semantics<parallel>, #tpu.dimension_semantics<parallel>, #tpu.dimension_semantics<arbitrary>], iteration_bounds = array<i64: 1, 1, 1>, scalar_prefetch = 0 : i64, scratch_operands = 1 : i64, tpu.core_type = #tpu.core_type<tc>, window_params = [{transform_indices = @transform_0, window_bounds = array<i64: 32, 32>}, {transform_indices = @transform_1, window_bounds = array<i64: 32, 64>}, {transform_indices = @transform_2, window_bounds = array<i64: 32, 64>}]} {
    %c0_i32 = arith.constant 0 : i32
    %0 = arith.cmpi eq, %arg2, %c0_i32 : i32
    %1 = arith.extui %0 : i1 to i32
    %c0_i32_0 = arith.constant 0 : i32
    %2 = arith.cmpi ne, %1, %c0_i32_0 : i32
    scf.if %2 {
      %cst_10 = arith.constant 0.000000e+00 : f32
      %12 = vector.broadcast %cst_10 : f32 to vector<32x64xf32>
      %c0_11 = arith.constant 0 : index
      %c0_12 = arith.constant 0 : index
      %13 = vector.load %arg6[%c0_11, %c0_12] : memref<32x64xf32, #tpu.memory_space<vmem>>, vector<32x64xf32>
      tpu.vector_store %arg6[%c0_11, %c0_12], %12 {strides = array<i32>} : memref<32x64xf32, #tpu.memory_space<vmem>>, vector<32x64xf32>,
    } else {
    }
    %c0 = arith.constant 0 : index
    %c0_1 = arith.constant 0 : index
    %3 = vector.load %arg6[%c0, %c0_1] : memref<32x64xf32, #tpu.memory_space<vmem>>, vector<32x64xf32>
    %c0_2 = arith.constant 0 : index
    %c0_3 = arith.constant 0 : index
    %4 = vector.load %arg3[%c0_2, %c0_3] : memref<32x32xf32, #tpu.memory_space<vmem>>, vector<32x32xf32>
    %c0_4 = arith.constant 0 : index
    %c0_5 = arith.constant 0 : index
    %5 = vector.load %arg4[%c0_4, %c0_5] : memref<32x64xf32, #tpu.memory_space<vmem>>, vector<32x64xf32>
    %cst = arith.constant dense<0.000000e+00> : vector<32x64xf32>
    %6 = tpu.matmul %4, %5, %cst {dimension_numbers = #tpu.dot_dimension_numbers<[1], [0], [0], [1], [0, 0, 1, 1], [], []>} : vector<32x32xf32>, vector<32x64xf32>, vector<32x64xf32> -> vector<32x64xf32>
    %7 = arith.addf %3, %6 : vector<32x64xf32>
    %c0_6 = arith.constant 0 : index
    %c0_7 = arith.constant 0 : index
    %8 = vector.load %arg6[%c0_6, %c0_7] : memref<32x64xf32, #tpu.memory_space<vmem>>, vector<32x64xf32>
    tpu.vector_store %arg6[%c0_6, %c0_7], %7 {strides = array<i32>} : memref<32x64xf32, #tpu.memory_space<vmem>>, vector<32x64xf32>,
    %c0_i32_8 = arith.constant 0 : i32
    %9 = arith.cmpi eq, %arg2, %c0_i32_8 : i32
    %10 = arith.extui %9 : i1 to i32
    %c0_i32_9 = arith.constant 0 : i32
    %11 = arith.cmpi ne, %10, %c0_i32_9 : i32
    scf.if %11 {
      %c0_10 = arith.constant 0 : index
      %c0_11 = arith.constant 0 : index
      %12 = vector.load %arg6[%c0_10, %c0_11] : memref<32x64xf32, #tpu.memory_space<vmem>>, vector<32x64xf32>
      %c0_12 = arith.constant 0 : index
      %c0_13 = arith.constant 0 : index
      %13 = vector.load %arg5[%c0_12, %c0_13] : memref<32x64xf32, #tpu.memory_space<vmem>>, vector<32x64xf32>
      tpu.vector_store %arg5[%c0_12, %c0_13], %12 {strides = array<i32>} : memref<32x64xf32, #tpu.memory_space<vmem>>, vector<32x64xf32>,
    } else {
    }
    return
  }
  func.func @transform_0(%arg0: i32, %arg1: i32, %arg2: i32) -> (i32, i32) {
    %c0_i32 = arith.constant 0 : i32
    return %arg0, %arg2 : i32, i32
  }
  func.func @transform_1(%arg0: i32, %arg1: i32, %arg2: i32) -> (i32, i32) {
    %c0_i32 = arith.constant 0 : i32
    return %arg2, %arg1 : i32, i32
  }
  func.func @transform_2(%arg0: i32, %arg1: i32, %arg2: i32) -> (i32, i32) {
    %c0_i32 = arith.constant 0 : i32
    return %arg0, %arg1 : i32, i32
  }
}

</mosaic_0001>

<bundles_post_ra>
// kernel: tpu_custom_call.1
= control target key start
LH: loop header
LB: loop body
LE: loop exit
PB: predicated region body
PF: predicated region fallthrough
CT: control target
= control target key end

     0   :  { %7 = vsyncpa [#allocation4], 0  ;;  %s354_s0 = inlined_call_operand.hbm [shape: f32[32,32], index: 0, kind: input, shape index: {}]   ;;  %s355_s1 = inlined_call_operand.hbm [shape: f32[32,64], index: 1, kind: input, shape index: {}]   ;;  %s356_s2 = inlined_call_operand.hbm [shape: f32[32,64], index: 2, kind: output, shape index: {}]  }
   0x1   :  { %8 = vsyncpa [#allocation7], 0 }
   0x2   :  { %9 = vsyncpa [#allocation5], 0  ;;  %s303_s9 = smov [#allocation3]  }
   0x3   :  { %s15_s10 = sshll.u32 %s303_s9, 4  ;;  %s16_s10 = int_to_ptr.vmem [resolvable:$true] %s15_s10 }
   0x4   :  { %s245_s11 = scalar_lea.vmem %s16_s10, 512  ;;  %p250_p1 = scmp.lt.s32.totalorder %s16_s10, %s16_s10 }
   0x5   :  { %p246_p0 = scmp.ne.s32.totalorder %s16_s10, %s245_s11  ;;  %p251_p2 = scmp.lt.s32.totalorder %s245_s11, %s245_s11 }
   0x7   :  { %p252_p3 = por %p251_p2, %p250_p1 }
   0x9   :  { %p253_p4 = pnand %p252_p3, %p246_p0 }
   0xb   :  { %256 = shalt.err (!%p253_p4)
}
   0xc   :  { %s304_s12 = smov 128   ;;  %s305_s13 = smov 8  }
   0xd   :  { %21 = dma.hbm_to_vmem [thread:$0]  %s354_s0, 512, %s16_s10, [#allocation4], %s304_s12, %s304_s12, %s305_s13  }
   0xe   :  { %s306_s16 = smov [#allocation6]  }
   0xf   :  { %s27_s17 = sshll.u32 %s306_s16, 4  ;;  %s28_s17 = int_to_ptr.vmem [resolvable:$true] %s27_s17 }
  0x10   :  { %s265_s18 = scalar_lea.vmem %s28_s17, 512  ;;  %p270_p6 = scmp.lt.s32.totalorder %s28_s17, %s28_s17 }
  0x11   :  { %p266_p5 = scmp.ne.s32.totalorder %s28_s17, %s265_s18  ;;  %p271_p7 = scmp.lt.s32.totalorder %s265_s18, %s265_s18 }
  0x13   :  { %p272_p8 = por %p271_p7, %p270_p6 }
  0x15   :  { %p273_p9 = pnand %p272_p8, %p266_p5 }
  0x17   :  { %276 = shalt.err (!%p273_p9)
}
  0x18   :  { %33 = dma.hbm_to_vmem [thread:$0]  %s355_s1, 512, %s28_s17, [#allocation7], %s304_s12, %s304_s12, %s305_s13  }
  0x19   :  { %297 = dma.done.wait [#allocation4], 512  }
  0x1a   :  { %298 = vsyncadd [#allocation4], 4294966784 }
  0x1b   :  { %299 = dma.done.wait [#allocation7], 512  }
  0x1c   :  { %300 = vsyncadd [#allocation7], 4294966784  ;;  %vm44_vm0 = vcmask 523264   ;;  %v307_v0 = vmov 0.0   ;;  %v60_v1 = vld [vmem:[#allocation6 + $0x18] sm:$0xff]  ;;  %v59_v2 = vld [vmem:[#allocation6 + $0x10] sm:$0xff] }
  0x1d   :  { %46 = vst.msk [vmem:[#allocation2 + $0x8] sm:$0xff] %vm44_vm0, %v307_v0  ;;  %45 = vst.msk [vmem:[#allocation2] sm:$0xff] %vm44_vm0, %v307_v0  ;;  %209 = vmatprep.subr.mxu0 %v60_v1  ;;  %223 = vmatprep.subr.mxu1 %v60_v1  ;;  %v58_v3 = vld [vmem:[#allocation6 + $0x8] sm:$0xff]  ;;  %v57_v4 = vld [vmem:[#allocation6] sm:$0xff]  ;;  %vm61_vm1 = vcmask 261120   ;;  %s308_s0 = smov [#allocation8]  }
  0x1e   :  { %47 = vst.msk [vmem:[#allocation2 + $0x10] sm:$0xff] %vm44_vm0, %v307_v0  ;;  %48 = vst.msk [vmem:[#allocation2 + $0x18] sm:$0xff] %vm44_vm0, %v307_v0  ;;  %210 = vmatpush3.msra.mxu0 %v60_v1  ;;  %227 = vmatpush3.msra.mxu1 %v60_v1  ;;  %v53_v5 = vld [vmem:[#allocation3] sm:$0xff]  ;;  %v55_v6 = vld [vmem:[#allocation3 + $0x10] sm:$0xff]  ;;  %s184_s1 = sshll.u32 %s308_s0, 4  ;;  %s185_s1 = int_to_ptr.vmem [resolvable:$true] %s184_s1 }
  0x1f   :  { %211 = vmatprep.subr.mxu0 %v59_v2  ;;  %224 = vmatprep.subr.mxu1 %v59_v2  ;;  %v54_v7 = vld [vmem:[#allocation3 + $0x8] sm:$0xff]  ;;  %v56_v8 = vld [vmem:[#allocation3 + $0x18] sm:$0xff]  ;;  %s277_s21 = scalar_lea.vmem %s185_s1, 512  ;;  %p282_p11 = scmp.lt.s32.totalorder %s185_s1, %s185_s1 }
  0x20   :  { %212 = vmatpush3.msra.mxu0 %v59_v2  ;;  %228 = vmatpush3.msra.mxu1 %v59_v2  ;;  %p278_p10 = scmp.ne.s32.totalorder %s185_s1, %s277_s21  ;;  %p283_p12 = scmp.lt.s32.totalorder %s277_s21, %s277_s21 }
  0x21   :  { %213 = vmatprep.subr.mxu0 %v58_v3  ;;  %225 = vmatprep.subr.mxu1 %v58_v3 }
  0x22   :  { %214 = vmatpush3.msra.mxu0 %v58_v3  ;;  %229 = vmatpush3.msra.mxu1 %v58_v3  ;;  %p284_p13 = por %p283_p12, %p282_p11 }
  0x23   :  { %215 = vmatprep.subr.mxu0 %v57_v4  ;;  %226 = vmatprep.subr.mxu1 %v57_v4 }
  0x24   :  { %216 = vmatpush3.msra.mxu0 %v57_v4  ;;  %230 = vmatpush3.msra.mxu1 %v57_v4  ;;  %v50_v9 = vld [vmem:[#allocation2 + $0x8] sm:$0xff]  ;;  %v49_v13 = vld [vmem:[#allocation2] sm:$0xff]  ;;  %p285_p0 = pnand %p284_p13, %p278_p10 }
  0x25   :  { %217 = vmatprep.mubr.msk.f32.mxu0 %vm61_vm1, %v53_v5  ;;  %220 = vmatprep.mubr.msk.f32.mxu1 %vm61_vm1, %v55_v6  ;;  %v52_v10 = vld [vmem:[#allocation2 + $0x18] sm:$0xff]  ;;  %v51_v14 = vld [vmem:[#allocation2 + $0x10] sm:$0xff] }
  0x26   :  { %218 = vmatmul.mubr.msk.f32.vlgmr.msra.gmra.mxu0 %vm61_vm1, %v54_v7  ;;  %221 = vmatmul.mubr.msk.f32.vlgmr.msra.gmra.mxu1 %vm61_vm1, %v56_v8 }
  0xe6   :  { %v219_v11 = vpop.f32.mrf.mxu0  ;;  %v222_v12 = vpop.f32.mrf.mxu1 }
  0xe7   :  { %v160_v15 = vadd.f32 %v219_v11, %v50_v9  ;;  %v162_v16 = vadd.f32 %v222_v12, %v52_v10 }
  0xe8   :  { %v140_v17 = vpop.f32.mrf.mxu0  ;;  %v150_v18 = vpop.f32.mrf.mxu1 }
  0xe9   :  { %165 = vst.msk [vmem:[#allocation2 + $0x8] sm:$0xff] %vm44_vm0, %v160_v15  ;;  %167 = vst.msk [vmem:[#allocation2 + $0x18] sm:$0xff] %vm44_vm0, %v162_v16  ;;  %v159_v19 = vadd.f32 %v140_v17, %v49_v13  ;;  %v161_v20 = vadd.f32 %v150_v18, %v51_v14 }
  0xeb   :  { %164 = vst.msk [vmem:[#allocation2] sm:$0xff] %vm44_vm0, %v159_v19  ;;  %166 = vst.msk [vmem:[#allocation2 + $0x10] sm:$0xff] %vm44_vm0, %v161_v20 }
  0xf0   :  { %v172_v21 = vld [vmem:[#allocation2 + $0x8] sm:$0xff]  ;;  %v174_v22 = vld [vmem:[#allocation2 + $0x18] sm:$0xff] }
  0xf1   :  { %176 = vst.msk [vmem:[#allocation8 + $0x8] sm:$0xff] %vm44_vm0, %v172_v21  ;;  %178 = vst.msk [vmem:[#allocation8 + $0x18] sm:$0xff] %vm44_vm0, %v174_v22 }
  0xf2   :  { %v171_v23 = vld [vmem:[#allocation2] sm:$0xff]  ;;  %v173_v24 = vld [vmem:[#allocation2 + $0x10] sm:$0xff] }
  0xf3   :  { %175 = vst.msk [vmem:[#allocation8] sm:$0xff] %vm44_vm0, %v171_v23  ;;  %177 = vst.msk [vmem:[#allocation8 + $0x10] sm:$0xff] %vm44_vm0, %v173_v24 }
  0xf4   :  { %288 = shalt.err (!%p285_p0)
}
  0xf5   :  { %190 = dma.vmem_to_hbm [thread:$0]  %s185_s1, 512, %s356_s2, [#allocation5], %s304_s12, %s304_s12, %s305_s13  }
  0xf6   :  { %301 = dma.done.wait [#allocation5], 512  }
  0xf7   :  { %302 = vsyncadd [#allocation5], 4294966784 }
  0xf8   :  { %194 = vsyncpa [#allocation4], 1 }
  0xf9   :  { %195 = vsyncpa [#allocation7], 1 }
  0xfa   :  { %196 = vsyncpa [#allocation5], 1 }

</bundles_post_ra>
